<compile_context>
chip_gen: v6e
topology: v6e:2x2x1
jax: 0.10.0
libtpu: 0.0.40
codegen_flags: <defaults>
</compile_context>

<pallas_src>
import math
import functools

import jax
import jax.numpy as jnp
from jax.experimental import pallas as pl
from jax.experimental.pallas import tpu as pltpu

VMEM_SPEC = pl.BlockSpec(memory_space=pltpu.MemorySpace.VMEM)


def _round_up(x, m):
    return ((x + m - 1) // m) * m


# ----------------------------------------------------------------------------
# Kernel 1: fused multi-layer encoder (node-level linears + ReLU) + per-graph
# mean-pool accumulation, gridded over N.
# ----------------------------------------------------------------------------
def _encoder_kernel(*refs, n_layers, n_hidden):
    x_ref = refs[0]
    pos_ref = refs[1 + 2 * n_layers]      # (T, G) f32 pos mask tile
    invc_ref = refs[2 + 2 * n_layers]     # (1, G) f32 1/count (resident)
    o_ref = refs[3 + 2 * n_layers]        # (T, H*L) bf16
    g0_ref = refs[4 + 2 * n_layers]       # (G, H) f32 resident accumulator

    @pl.when(pl.program_id(0) == 0)
    def _():
        g0_ref[...] = jnp.zeros_like(g0_ref)

    h = x_ref[...].astype(jnp.bfloat16)
    a = None
    for l in range(n_layers):
        w = refs[1 + 2 * l][...]          # bf16 (d_in, H), resident
        b = refs[2 + 2 * l][...]          # f32  (1, H),    resident
        a = jnp.maximum(jnp.dot(h, w, preferred_element_type=jnp.float32) + b, 0.0)
        o_ref[:, l * n_hidden:(l + 1) * n_hidden] = a.astype(o_ref.dtype)
        h = a.astype(jnp.bfloat16)

    # Mean-pool contribution of this node tile: g0 += (pos * 1/count)^T @ h_last.
    w_pool = pos_ref[...] * invc_ref[...]                        # (T, G)
    g0_ref[...] += jax.lax.dot_general(
        w_pool, a, dimension_numbers=(((0,), (0,)), ((), ())),
        preferred_element_type=jnp.float32)                      # (G, H)


def encoder_layers(features_pad, layer_params, pos_mask, inv_counts, *, tile, n_hidden):
    n_pad, in_feats = features_pad.shape
    n_layers = len(layer_params)
    out_w = n_hidden * n_layers
    num_g = pos_mask.shape[1]

    args = [features_pad]
    in_specs = [pl.BlockSpec((tile, in_feats), lambda i: (i, 0))]
    for (w, b) in layer_params:
        wb = w.astype(jnp.bfloat16)
        bb = b.reshape(1, -1).astype(jnp.float32)
        args += [wb, bb]
        in_specs += [pl.BlockSpec(wb.shape, lambda i: (0, 0)),
                     pl.BlockSpec(bb.shape, lambda i: (0, 0))]
    args += [pos_mask, inv_counts]
    in_specs += [pl.BlockSpec((tile, num_g), lambda i: (i, 0)),
                 pl.BlockSpec(inv_counts.shape, lambda i: (0, 0))]

    flops = 2 * n_pad * (in_feats * n_hidden + (n_layers - 1) * n_hidden * n_hidden
                         + num_g * n_hidden)
    bytes_accessed = (features_pad.size * 4 + n_pad * out_w * 2 + pos_mask.size * 4
                      + num_g * n_hidden * 4
                      + sum(w.size * 2 + b.size * 4 for (w, b) in layer_params))

    return pl.pallas_call(
        functools.partial(_encoder_kernel, n_layers=n_layers, n_hidden=n_hidden),
        out_shape=(jax.ShapeDtypeStruct((n_pad, out_w), jnp.bfloat16),
                   jax.ShapeDtypeStruct((num_g, n_hidden), jnp.float32)),
        grid=(n_pad // tile,),
        in_specs=in_specs,
        out_specs=(pl.BlockSpec((tile, out_w), lambda i: (i, 0)),
                   pl.BlockSpec((num_g, n_hidden), lambda i: (0, 0))),
        compiler_params=pltpu.CompilerParams(
            dimension_semantics=("arbitrary",),   # g0 accumulated across node tiles
            vmem_limit_bytes=32 * 1024 * 1024),
        cost_estimate=pl.CostEstimate(flops=int(flops), transcendentals=0,
                                      bytes_accessed=int(bytes_accessed)),
    )(*args)


# ----------------------------------------------------------------------------
# Kernel 2: fused graph-level readout MLP (tiny: G rows), single VMEM block.
# ----------------------------------------------------------------------------
def _readout_kernel(*refs, n_lin):
    g_ref, o_ref = refs[0], refs[-1]
    h = g_ref[...]
    for l in range(n_lin):
        w = refs[1 + 2 * l][...]
        b = refs[2 + 2 * l][...]
        h = jnp.dot(h, w, preferred_element_type=jnp.float32) + b
        if l < n_lin - 1:
            h = jnp.maximum(h, 0.0)
    o_ref[...] = h


def readout(g0, readout_params):
    n_lin = len(readout_params)
    out_dim = readout_params[-1][0].shape[1]
    args = [g0.astype(jnp.float32)]
    for (w, b) in readout_params:
        args += [w.astype(jnp.float32), b.reshape(1, -1).astype(jnp.float32)]
    return pl.pallas_call(
        functools.partial(_readout_kernel, n_lin=n_lin),
        out_shape=jax.ShapeDtypeStruct((g0.shape[0], out_dim), jnp.float32),
        in_specs=[VMEM_SPEC] * len(args),
        out_specs=VMEM_SPEC,
    )(*args)


# ----------------------------------------------------------------------------
# Kernel 3: fused FeedforwardNetwork (local_d) + local/global JSD loss.
#   Per node tile:  local_h = block(x) + jump(x)
#                   res     = local_h @ g_enc.T        (contract over D in-kernel)
#                   sp      = softplus(-res)           (computed once)
#                   e_pos  += sum(pos * (log2 - sp))
#                   e_neg  += sum(neg * (sp + res - log2))
#   loss accumulated directly in the resident (1,1) output across the grid.
# ----------------------------------------------------------------------------
def _ffn_loss_kernel(x_ref, w1, b1, w2, b2, w3, b3, wj, bj,
                     g_ref, pos_ref, neg_ref, o_ref, *, inv_pos, inv_neg):
    @pl.when(pl.program_id(0) == 0)
    def _():
        o_ref[...] = jnp.zeros_like(o_ref)

    x = x_ref[...]                                                  # bf16 (T, ffn_in)
    h = jnp.maximum(jnp.dot(x, w1[...], preferred_element_type=jnp.float32) + b1[...], 0.0)
    h = jnp.maximum(jnp.dot(h.astype(jnp.bfloat16), w2[...],
                            preferred_element_type=jnp.float32) + b2[...], 0.0)
    blk = jnp.dot(h.astype(jnp.bfloat16), w3[...], preferred_element_type=jnp.float32) + b3[...]
    jmp = jnp.dot(x, wj[...], preferred_element_type=jnp.float32) + bj[...]
    local_h = blk + jmp                                             # f32 (T, out_dim)

    # res = local_h @ g_enc.T without any host-side transpose of g_enc.
    res = jax.lax.dot_general(local_h, g_ref[...],
                              dimension_numbers=(((1,), (1,)), ((), ())),
                              preferred_element_type=jnp.float32)   # (T, G)

    log2 = math.log(2.0)
    sp = jnp.maximum(-res, 0.0) + jnp.log1p(jnp.exp(-jnp.abs(res)))  # softplus(-res)
    e_pos = jnp.sum(pos_ref[...] * (log2 - sp))
    e_neg = jnp.sum(neg_ref[...] * (sp + res - log2))
    delta = e_neg * inv_neg - e_pos * inv_pos
    o_ref[...] = o_ref[...] + jnp.broadcast_to(delta, (1, 1))


def ffn_local_global_loss(local_in, p, g_enc, pos_mask, neg_mask, *,
                          tile, num_nodes, num_graphs):
    n_pad, ffn_in = local_in.shape
    hid = p["w1"].shape[1]
    out_dim = p["w3"].shape[1]
    num_g = g_enc.shape[0]

    inv_pos = 1.0 / float(num_nodes)
    inv_neg = 1.0 / float(num_nodes * (num_graphs - 1))

    wb = lambda w: w.astype(jnp.bfloat16)
    bb = lambda b: b.reshape(1, -1).astype(jnp.float32)
    const = lambda a: pl.BlockSpec(a.shape, lambda i: (0, 0))

    weights = [wb(p["w1"]), bb(p["b1"]), wb(p["w2"]), bb(p["b2"]),
               wb(p["w3"]), bb(p["b3"]), wb(p["wj"]), bb(p["bj"])]
    g32 = g_enc.astype(jnp.float32)

    in_specs = ([pl.BlockSpec((tile, ffn_in), lambda i: (i, 0))]
                + [const(a) for a in weights]
                + [const(g32),
                   pl.BlockSpec((tile, num_g), lambda i: (i, 0)),
                   pl.BlockSpec((tile, num_g), lambda i: (i, 0))])

    flops = 2 * n_pad * (ffn_in * hid + hid * hid + hid * out_dim
                         + ffn_in * out_dim + out_dim * num_g)
    transcendentals = 2 * n_pad * num_g
    bytes_accessed = (local_in.size * 2 + pos_mask.size * 4 + neg_mask.size * 4
                      + sum(a.size * a.dtype.itemsize for a in weights)
                      + g32.size * 4 + 4)

    return pl.pallas_call(
        functools.partial(_ffn_loss_kernel, inv_pos=inv_pos, inv_neg=inv_neg),
        out_shape=jax.ShapeDtypeStruct((1, 1), jnp.float32),
        grid=(n_pad // tile,),
        in_specs=in_specs,
        out_specs=pl.BlockSpec((1, 1), lambda i: (0, 0)),
        compiler_params=pltpu.CompilerParams(
            dimension_semantics=("arbitrary",),   # loss accumulator carried across N-tiles
            vmem_limit_bytes=32 * 1024 * 1024),
        cost_estimate=pl.CostEstimate(flops=int(flops),
                                      transcendentals=int(transcendentals),
                                      bytes_accessed=int(bytes_accessed)),
    )(local_in, *weights, g32, pos_mask, neg_mask)


# ----------------------------------------------------------------------------
# InfoGraph forward (glue in plain JAX, all hot matmuls/elementwise in Pallas)
# ----------------------------------------------------------------------------
# TODO(synk): the real `encoder` is an external GNN passed into __init__; here a
# per-node MLP with per-graph mean-pool readout stands in (same interface/shapes).
def infograph_forward(features, batch_num_nodes, enc_params, ffn_params):
    num_graphs = len(batch_num_nodes)
    assert num_graphs >= 2, "JSD negative term divides by N*(G-1); need >= 2 graphs"
    num_nodes = int(sum(batch_num_nodes))
    n_hidden = enc_params["layers"][0][0].shape[1]

    # Row tile: 8-aligned, capped at 256 (good pipelining / VMEM fit on v5e/v6e/v7x).
    tile = min(256, _round_up(num_nodes, 8))
    n_pad = _round_up(num_nodes, tile)
    pad = n_pad - num_nodes

    # graph_id / masks (host glue). Padded rows get all-zero pos AND neg masks so
    # they contribute exactly 0 to pooling and to both loss terms.
    graph_id = jnp.concatenate(
        [jnp.full((n,), i, dtype=jnp.int32) for i, n in enumerate(batch_num_nodes)])
    pos_valid = jax.nn.one_hot(graph_id, num_graphs, dtype=jnp.float32)     # (N, G)
    pos_mask = jnp.pad(pos_valid, ((0, pad), (0, 0)))                        # (N_pad, G)
    neg_mask = jnp.pad(1.0 - pos_valid, ((0, pad), (0, 0)))                  # (N_pad, G)
    counts = jnp.asarray(batch_num_nodes, dtype=jnp.float32)
    inv_counts = (1.0 / counts).reshape(1, num_graphs)                       # (1, G)

    feat_pad = jnp.pad(features.astype(jnp.float32), ((0, pad), (0, 0)))     # (N_pad, F)

    # Fused encoder: concatenated intermediates + pooled last-layer sums (g0).
    enc_out, g0 = encoder_layers(feat_pad, enc_params["layers"], pos_mask, inv_counts,
                                 tile=tile, n_hidden=n_hidden)   # (N_pad, H*L) bf16, (G, H) f32

    # Graph-level readout MLP (Pallas, tiny).
    g_enc = readout(g0, enc_params["readout"])                               # (G, out_dim)

    # Fused local_d FFN + local/global JSD loss (no HBM round trip for local_h).
    loss = ffn_local_global_loss(enc_out, ffn_params, g_enc, pos_mask, neg_mask,
                                 tile=tile, num_nodes=num_nodes,
                                 num_graphs=num_graphs)                      # (1, 1)
    return loss[0, 0]


# ----------------------------------------------------------------------------
# Pure-JAX reference (mirrors the PyTorch module / stand-in encoder), for checking.
# ----------------------------------------------------------------------------
def _reference_loss(features, batch_num_nodes, enc_params, ffn_params):
    num_graphs = len(batch_num_nodes)
    num_nodes = features.shape[0]
    h = features.astype(jnp.float32)
    inter = []
    for (w, b) in enc_params["layers"]:
        h = jnp.maximum(h @ w + b, 0.0)
        inter.append(h)
    graph_id = jnp.concatenate(
        [jnp.full((n,), i, dtype=jnp.int32) for i, n in enumerate(batch_num_nodes)])
    pos = jax.nn.one_hot(graph_id, num_graphs, dtype=jnp.float32)
    counts = jnp.asarray(batch_num_nodes, dtype=jnp.float32)
    g = (pos / counts[None, :]).T @ inter[-1]
    for li, (w, b) in enumerate(enc_params["readout"]):
        g = g @ w + b
        if li < len(enc_params["readout"]) - 1:
            g = jnp.maximum(g, 0.0)
    x = jnp.concatenate(inter, axis=-1)
    p = ffn_params
    hh = jnp.maximum(x @ p["w1"] + p["b1"], 0.0)
    hh = jnp.maximum(hh @ p["w2"] + p["b2"], 0.0)
    local_h = hh @ p["w3"] + p["b3"] + x @ p["wj"] + p["bj"]
    res = local_h @ g.T
    log2 = math.log(2.0)
    neg = 1.0 - pos
    e_pos = jnp.sum(log2 - jax.nn.softplus(-(res * pos))) / num_nodes
    e_neg = jnp.sum(jax.nn.softplus(-(res * neg)) + res * neg - log2) / (
        num_nodes * (num_graphs - 1))
    return e_neg - e_pos


# ----------------------------------------------------------------------------
# Deterministic parameter / input construction and smoke run
# ----------------------------------------------------------------------------
def _init_linear(key, in_dim, out_dim):
    kw, kb = jax.random.split(key)
    w = jax.random.normal(kw, (in_dim, out_dim), jnp.float32) * (1.0 / math.sqrt(in_dim))
    b = jax.random.normal(kb, (out_dim,), jnp.float32) * 0.01
    return w, b


if __name__ == "__main__":
    key = jax.random.PRNGKey(0)

    # encoder hyper-params (match module usage: n_hidden, n_layers, n_mlp_layers)
    in_feats = 8
    n_hidden = 32
    n_layers = 3
    n_mlp_layers = 2
    out_dim = n_hidden // (1 << n_mlp_layers)   # 8
    batch_num_nodes = [8, 8]                    # 2 graphs, 16 nodes total
    num_nodes = sum(batch_num_nodes)

    keys = jax.random.split(key, 16)
    ki = iter(keys)

    # encoder params: n_layers node-level linears + n_mlp_layers readout linears
    enc_layers = []
    d = in_feats
    for _ in range(n_layers):
        enc_layers.append(_init_linear(next(ki), d, n_hidden))
        d = n_hidden
    ro = []
    d = n_hidden
    for _ in range(n_mlp_layers):
        ro.append(_init_linear(next(ki), d, d // 2))
        d //= 2
    enc_params = {"layers": enc_layers, "readout": ro}

    # local_d FeedforwardNetwork params: in = n_hidden*n_layers, hid = n_hidden, out = out_dim
    ffn_in = n_hidden * n_layers
    w1, b1 = _init_linear(next(ki), ffn_in, n_hidden)
    w2, b2 = _init_linear(next(ki), n_hidden, n_hidden)
    w3, b3 = _init_linear(next(ki), n_hidden, out_dim)
    wj, bj = _init_linear(next(ki), ffn_in, out_dim)
    ffn_params = {"w1": w1, "b1": b1, "w2": w2, "b2": b2,
                  "w3": w3, "b3": b3, "wj": wj, "bj": bj}

    features = jax.random.normal(next(ki), (num_nodes, in_feats), jnp.float32)

    loss = infograph_forward(features, batch_num_nodes, enc_params, ffn_params)
    loss = jax.block_until_ready(loss)

    ref = _reference_loss(features, batch_num_nodes, enc_params, ffn_params)
    ref = jax.block_until_ready(ref)

    assert loss.shape == () and bool(jnp.isfinite(loss)), f"bad loss: {loss}"
    assert abs(float(loss) - float(ref)) <= 0.05 + 0.05 * abs(float(ref)), (
        f"mismatch: kernel={float(loss)} ref={float(ref)}")
    print("KERNEL_OK")
</pallas_src>

<mosaic_0001>
module attributes {stable_mosaic.version = 11 : i64} {
  func.func @_encoder_kernel(%arg0: i32, %arg1: memref<16x8xf32, #tpu.memory_space<vmem>>, %arg2: memref<8x32xbf16, #tpu.memory_space<vmem>>, %arg3: memref<1x32xf32, #tpu.memory_space<vmem>>, %arg4: memref<32x32xbf16, #tpu.memory_space<vmem>>, %arg5: memref<1x32xf32, #tpu.memory_space<vmem>>, %arg6: memref<32x32xbf16, #tpu.memory_space<vmem>>, %arg7: memref<1x32xf32, #tpu.memory_space<vmem>>, %arg8: memref<16x2xf32, #tpu.memory_space<vmem>>, %arg9: memref<1x2xf32, #tpu.memory_space<vmem>>, %arg10: memref<16x96xbf16, #tpu.memory_space<vmem>>, %arg11: memref<2x32xf32, #tpu.memory_space<vmem>>) attributes {dimension_semantics = [#tpu.dimension_semantics<arbitrary>], iteration_bounds = array<i64: 1>, scalar_prefetch = 0 : i64, scratch_operands = 0 : i64, tpu.core_type = #tpu.core_type<tc>, window_params = [{transform_indices = @transform_0, window_bounds = array<i64: 16, 8>}, {pipeline_mode = #tpu.pipeline_mode<synchronous>, transform_indices = @transform_1, window_bounds = array<i64: 8, 32>}, {pipeline_mode = #tpu.pipeline_mode<synchronous>, transform_indices = @transform_2, window_bounds = array<i64: 1, 32>}, {pipeline_mode = #tpu.pipeline_mode<synchronous>, transform_indices = @transform_3, window_bounds = array<i64: 32, 32>}, {pipeline_mode = #tpu.pipeline_mode<synchronous>, transform_indices = @transform_4, window_bounds = array<i64: 1, 32>}, {pipeline_mode = #tpu.pipeline_mode<synchronous>, transform_indices = @transform_5, window_bounds = array<i64: 32, 32>}, {pipeline_mode = #tpu.pipeline_mode<synchronous>, transform_indices = @transform_6, window_bounds = array<i64: 1, 32>}, {transform_indices = @transform_7, window_bounds = array<i64: 16, 2>}, {pipeline_mode = #tpu.pipeline_mode<synchronous>, transform_indices = @transform_8, window_bounds = array<i64: 1, 2>}, {transform_indices = @transform_9, window_bounds = array<i64: 16, 96>}, {pipeline_mode = #tpu.pipeline_mode<synchronous>, transform_indices = @transform_10, window_bounds = array<i64: 2, 32>}]} {
    %c0_i32 = arith.constant 0 : i32
    %0 = arith.cmpi eq, %arg0, %c0_i32 : i32
    %1 = arith.extui %0 : i1 to i32
    %c0_i32_0 = arith.constant 0 : i32
    %2 = arith.cmpi ne, %1, %c0_i32_0 : i32
    scf.if %2 {
      %cst_32 = arith.constant 0.000000e+00 : f32
      %42 = vector.broadcast %cst_32 : f32 to vector<2x32xf32>
      %c0_33 = arith.constant 0 : index
      %c0_34 = arith.constant 0 : index
      %43 = vector.load %arg11[%c0_33, %c0_34] : memref<2x32xf32, #tpu.memory_space<vmem>>, vector<2x32xf32>
      tpu.vector_store %arg11[%c0_33, %c0_34], %42 {strides = array<i32>} : memref<2x32xf32, #tpu.memory_space<vmem>>, vector<2x32xf32>,
    } else {
    }
    %c0 = arith.constant 0 : index
    %c0_1 = arith.constant 0 : index
    %3 = vector.load %arg1[%c0, %c0_1] : memref<16x8xf32, #tpu.memory_space<vmem>>, vector<16x8xf32>
    %4 = arith.truncf %3 : vector<16x8xf32> to vector<16x8xbf16>
    %c0_2 = arith.constant 0 : index
    %c0_3 = arith.constant 0 : index
    %5 = vector.load %arg2[%c0_2, %c0_3] : memref<8x32xbf16, #tpu.memory_space<vmem>>, vector<8x32xbf16>
    %c0_4 = arith.constant 0 : index
    %c0_5 = arith.constant 0 : index
    %6 = vector.load %arg3[%c0_4, %c0_5] : memref<1x32xf32, #tpu.memory_space<vmem>>, vector<1x32xf32>
    %cst = arith.constant dense<0.000000e+00> : vector<16x32xf32>
    %7 = tpu.matmul %4, %5, %cst {dimension_numbers = #tpu.dot_dimension_numbers<[1], [0], [0], [1], [0, 0, 1, 1], [], []>} : vector<16x8xbf16>, vector<8x32xbf16>, vector<16x32xf32> -> vector<16x32xf32>
    %8 = vector.broadcast %6 : vector<1x32xf32> to vector<16x32xf32>
    %9 = arith.addf %7, %8 : vector<16x32xf32>
    %cst_6 = arith.constant 0.000000e+00 : f32
    %10 = vector.broadcast %cst_6 : f32 to vector<16x32xf32>
    %11 = arith.maximumf %9, %10 : vector<16x32xf32>
    %12 = arith.truncf %11 : vector<16x32xf32> to vector<16x32xbf16>
    %c0_7 = arith.constant 0 : index
    %c0_8 = arith.constant 0 : index
    %13 = vector.load %arg10[%c0_7, %c0_8] : memref<16x96xbf16, #tpu.memory_space<vmem>>, vector<16x32xbf16>
    tpu.vector_store %arg10[%c0_7, %c0_8], %12 {strides = array<i32>} : memref<16x96xbf16, #tpu.memory_space<vmem>>, vector<16x32xbf16>,
    %14 = arith.truncf %11 : vector<16x32xf32> to vector<16x32xbf16>
    %c0_9 = arith.constant 0 : index
    %c0_10 = arith.constant 0 : index
    %15 = vector.load %arg4[%c0_9, %c0_10] : memref<32x32xbf16, #tpu.memory_space<vmem>>, vector<32x32xbf16>
    %c0_11 = arith.constant 0 : index
    %c0_12 = arith.constant 0 : index
    %16 = vector.load %arg5[%c0_11, %c0_12] : memref<1x32xf32, #tpu.memory_space<vmem>>, vector<1x32xf32>
    %cst_13 = arith.constant dense<0.000000e+00> : vector<16x32xf32>
    %17 = tpu.matmul %14, %15, %cst_13 {dimension_numbers = #tpu.dot_dimension_numbers<[1], [0], [0], [1], [0, 0, 1, 1], [], []>} : vector<16x32xbf16>, vector<32x32xbf16>, vector<16x32xf32> -> vector<16x32xf32>
    %18 = vector.broadcast %16 : vector<1x32xf32> to vector<16x32xf32>
    %19 = arith.addf %17, %18 : vector<16x32xf32>
    %cst_14 = arith.constant 0.000000e+00 : f32
    %20 = vector.broadcast %cst_14 : f32 to vector<16x32xf32>
    %21 = arith.maximumf %19, %20 : vector<16x32xf32>
    %22 = arith.truncf %21 : vector<16x32xf32> to vector<16x32xbf16>
    %c0_15 = arith.constant 0 : index
    %c32 = arith.constant 32 : index
    %23 = vector.load %arg10[%c0_15, %c32] : memref<16x96xbf16, #tpu.memory_space<vmem>>, vector<16x32xbf16>
    tpu.vector_store %arg10[%c0_15, %c32], %22 {strides = array<i32>} : memref<16x96xbf16, #tpu.memory_space<vmem>>, vector<16x32xbf16>,
    %24 = arith.truncf %21 : vector<16x32xf32> to vector<16x32xbf16>
    %c0_16 = arith.constant 0 : index
    %c0_17 = arith.constant 0 : index
    %25 = vector.load %arg6[%c0_16, %c0_17] : memref<32x32xbf16, #tpu.memory_space<vmem>>, vector<32x32xbf16>
    %c0_18 = arith.constant 0 : index
    %c0_19 = arith.constant 0 : index
    %26 = vector.load %arg7[%c0_18, %c0_19] : memref<1x32xf32, #tpu.memory_space<vmem>>, vector<1x32xf32>
    %cst_20 = arith.constant dense<0.000000e+00> : vector<16x32xf32>
    %27 = tpu.matmul %24, %25, %cst_20 {dimension_numbers = #tpu.dot_dimension_numbers<[1], [0], [0], [1], [0, 0, 1, 1], [], []>} : vector<16x32xbf16>, vector<32x32xbf16>, vector<16x32xf32> -> vector<16x32xf32>
    %28 = vector.broadcast %26 : vector<1x32xf32> to vector<16x32xf32>
    %29 = arith.addf %27, %28 : vector<16x32xf32>
    %cst_21 = arith.constant 0.000000e+00 : f32
    %30 = vector.broadcast %cst_21 : f32 to vector<16x32xf32>
    %31 = arith.maximumf %29, %30 : vector<16x32xf32>
    %32 = arith.truncf %31 : vector<16x32xf32> to vector<16x32xbf16>
    %c0_22 = arith.constant 0 : index
    %c64 = arith.constant 64 : index
    %33 = vector.load %arg10[%c0_22, %c64] : memref<16x96xbf16, #tpu.memory_space<vmem>>, vector<16x32xbf16>
    tpu.vector_store %arg10[%c0_22, %c64], %32 {strides = array<i32>} : memref<16x96xbf16, #tpu.memory_space<vmem>>, vector<16x32xbf16>,
    %c0_23 = arith.constant 0 : index
    %c0_24 = arith.constant 0 : index
    %34 = vector.load %arg8[%c0_23, %c0_24] : memref<16x2xf32, #tpu.memory_space<vmem>>, vector<16x2xf32>
    %c0_25 = arith.constant 0 : index
    %c0_26 = arith.constant 0 : index
    %35 = vector.load %arg9[%c0_25, %c0_26] : memref<1x2xf32, #tpu.memory_space<vmem>>, vector<1x2xf32>
    %36 = vector.broadcast %35 : vector<1x2xf32> to vector<16x2xf32>
    %37 = arith.mulf %34, %36 : vector<16x2xf32>
    %c0_27 = arith.constant 0 : index
    %c0_28 = arith.constant 0 : index
    %38 = vector.load %arg11[%c0_27, %c0_28] : memref<2x32xf32, #tpu.memory_space<vmem>>, vector<2x32xf32>
    %cst_29 = arith.constant dense<0.000000e+00> : vector<2x32xf32>
    %39 = tpu.matmul %37, %31, %cst_29 {dimension_numbers = #tpu.dot_dimension_numbers<[0], [0], [1], [1], [0, 1, 1, 1], [], []>} : vector<16x2xf32>, vector<16x32xf32>, vector<2x32xf32> -> vector<2x32xf32>
    %40 = arith.addf %38, %39 : vector<2x32xf32>
    %c0_30 = arith.constant 0 : index
    %c0_31 = arith.constant 0 : index
    %41 = vector.load %arg11[%c0_30, %c0_31] : memref<2x32xf32, #tpu.memory_space<vmem>>, vector<2x32xf32>
    tpu.vector_store %arg11[%c0_30, %c0_31], %40 {strides = array<i32>} : memref<2x32xf32, #tpu.memory_space<vmem>>, vector<2x32xf32>,
    return
  }
  func.func @transform_0(%arg0: i32) -> (i32, i32) {
    %c0_i32 = arith.constant 0 : i32
    %c0_i32_0 = arith.constant 0 : i32
    return %arg0, %c0_i32 : i32, i32
  }
  func.func @transform_1(%arg0: i32) -> (i32, i32) {
    %c0_i32 = arith.constant 0 : i32
    %c0_i32_0 = arith.constant 0 : i32
    %c0_i32_1 = arith.constant 0 : i32
    return %c0_i32, %c0_i32_0 : i32, i32
  }
  func.func @transform_2(%arg0: i32) -> (i32, i32) {
    %c0_i32 = arith.constant 0 : i32
    %c0_i32_0 = arith.constant 0 : i32
    %c0_i32_1 = arith.constant 0 : i32
    return %c0_i32, %c0_i32_0 : i32, i32
  }
  func.func @transform_3(%arg0: i32) -> (i32, i32) {
    %c0_i32 = arith.constant 0 : i32
    %c0_i32_0 = arith.constant 0 : i32
    %c0_i32_1 = arith.constant 0 : i32
    return %c0_i32, %c0_i32_0 : i32, i32
  }
  func.func @transform_4(%arg0: i32) -> (i32, i32) {
    %c0_i32 = arith.constant 0 : i32
    %c0_i32_0 = arith.constant 0 : i32
    %c0_i32_1 = arith.constant 0 : i32
    return %c0_i32, %c0_i32_0 : i32, i32
  }
  func.func @transform_5(%arg0: i32) -> (i32, i32) {
    %c0_i32 = arith.constant 0 : i32
    %c0_i32_0 = arith.constant 0 : i32
    %c0_i32_1 = arith.constant 0 : i32
    return %c0_i32, %c0_i32_0 : i32, i32
  }
  func.func @transform_6(%arg0: i32) -> (i32, i32) {
    %c0_i32 = arith.constant 0 : i32
    %c0_i32_0 = arith.constant 0 : i32
    %c0_i32_1 = arith.constant 0 : i32
    return %c0_i32, %c0_i32_0 : i32, i32
  }
  func.func @transform_7(%arg0: i32) -> (i32, i32) {
    %c0_i32 = arith.constant 0 : i32
    %c0_i32_0 = arith.constant 0 : i32
    return %arg0, %c0_i32 : i32, i32
  }
  func.func @transform_8(%arg0: i32) -> (i32, i32) {
    %c0_i32 = arith.constant 0 : i32
    %c0_i32_0 = arith.constant 0 : i32
    %c0_i32_1 = arith.constant 0 : i32
    return %c0_i32, %c0_i32_0 : i32, i32
  }
  func.func @transform_9(%arg0: i32) -> (i32, i32) {
    %c0_i32 = arith.constant 0 : i32
    %c0_i32_0 = arith.constant 0 : i32
    return %arg0, %c0_i32 : i32, i32
  }
  func.func @transform_10(%arg0: i32) -> (i32, i32) {
    %c0_i32 = arith.constant 0 : i32
    %c0_i32_0 = arith.constant 0 : i32
    %c0_i32_1 = arith.constant 0 : i32
    return %c0_i32, %c0_i32_0 : i32, i32
  }
}

</mosaic_0001>

<bundles_post_ra>
// kernel: tpu_custom_call.1
= control target key start
LH: loop header
LB: loop body
LE: loop exit
PB: predicated region body
PF: predicated region fallthrough
CT: control target
= control target key end

     0   :  { %16 = vsyncpa [#allocation3], 0  ;;  %vm58_vm0 = vcmask 1043456   ;;  %v555_v2 = vmov 0.0   ;;  %vm556_vm1 = vmmov 0   ;;  %vm54_vm2 = vcmask 64512   ;;  %s682_s0 = inlined_call_operand.vmem [shape: f32[16,8], index: 0, kind: input, shape index: {}]   ;;  %s683_s1 = inlined_call_operand.vmem [shape: bf16[8,32], index: 1, kind: input, shape index: {}]   ;;  %s684_s2 = inlined_call_operand.vmem [shape: f32[1,32], index: 2, kind: input, shape index: {}]   ;;  %s685_s3 = inlined_call_operand.vmem [shape: bf16[32,32], index: 3, kind: input, shape index: {}]   ;;  %s686_s4 = inlined_call_operand.vmem [shape: f32[1,32], index: 4, kind: input, shape index: {}]   ;;  %s687_s5 = inlined_call_operand.vmem [shape: bf16[32,32], index: 5, kind: input, shape index: {}]   ;;  %s688_s6 = inlined_call_operand.vmem [shape: f32[1,32], index: 6, kind: input, shape index: {}]   ;;  %s689_s7 = inlined_call_operand.vmem [shape: f32[16,2], index: 7, kind: input, shape index: {}]   ;;  %s690_s8 = inlined_call_operand.vmem [shape: f32[1,2], index: 8, kind: input, shape index: {}]   ;;  %s691_s9 = inlined_call_operand.hbm [shape: bf16[16,96], index: 9, kind: output, shape index: {0}]   ;;  %s692_s10 = inlined_call_operand.hbm [shape: f32[2,32], index: 10, kind: output, shape index: {1}]  }
   0x1   :  { %v46_v0 = vld [vmem:[%s683_s1] sm:$0xf]  ;;  %471 = vmatprep.subr.bf16.mxu0 %v555_v2  ;;  %473 = vmatprep.mubr.msk.bf16.mxu0 %vm556_vm1, %v555_v2  ;;  %v44_v4 = vld [vmem:[%s682_s0 + $0x8] sm:$0xff] }
   0x2   :  { %v43_v1 = vld [vmem:[%s682_s0] sm:$0xff]  ;;  %v60_v3 = vsel %vm58_vm0, %v46_v0, 0  ;;  %477 = vmatprep.subr.bf16.mxu1 %v555_v2  ;;  %481 = vmatprep.mubr.msk.bf16.mxu1 %vm556_vm1, %v555_v2 }
   0x3   :  { %472 = vmatpush3.bf16.msra.mxu0 %v60_v3  ;;  %v45_v5 = vpack.c.bf16 %v44_v4, %v43_v1 }
   0x4   :  { %485 = vmatprep.subr.bf16.mxu0 %v555_v2 }
   0x5   :  { %17 = vsyncpa [#allocation5], 0  ;;  %v507_v6 = vld [vmem:[%s685_s3 + $0x8] sm:$0xff]   ;;  %v508_v7 = vld [vmem:[%s685_s3] sm:$0xff]   ;;  %vm113_vm3 = vcmask 257024   ;;  %vm139_vm4 = vcmask 261120  }
   0x6   :  { %474 = vmatmul.mubr.msk.bf16.vlgmr.msra.gmra.mxu0 %vm54_vm2, %v45_v5  ;;  %478 = vmatpush3.bf16.msra.mxu1 %v507_v6  ;;  %v436_v8 = vld [vmem:[%s684_s2] ss:$0 sm:$0xff]  ;;  %v509_v20 = vld [vmem:[%s687_s5 + $0x8] sm:$0xff]   ;;  %vm198_vm5 = vcmask 519424   ;;  %vm41_vm6 = vcmask 254976   ;;  %vm329_vm7 = vcmask 130048  }
   0x7   :  { %489 = vmatprep.mubr.msk.bf16.mxu0 %vm556_vm1, %v555_v2  ;;  %479 = vmatprep.subr.bf16.mxu1 %v555_v2  ;;  %v510_v21 = vld [vmem:[%s687_s5] sm:$0xff]   ;;  %v286_v24 = vld [vmem:[%s689_s7 + $0x8] sm:$0xff]  ;;  %s557_s5 = smov 32   ;;  %42 = vst.msk [vmem:[#allocation4] sm:$0x3] %vm41_vm6, %v555_v2  ;;  %vm282_vm8 = vcmask 781824  }
   0x8   :  { %486 = vmatpush3.bf16.msra.mxu0 %v509_v20  ;;  %v285_v22 = vld [vmem:[%s689_s7] sm:$0xff] }
   0x9   :  { %487 = vmatprep.subr.bf16.mxu0 %v555_v2  ;;  %v452_v23 = vld [vmem:[%s690_s8] ss:$0 sm:$0xff]  ;;  %s558_s8 = smov 64  }
   0xa   :  { %480 = vmatpush3.bf16.msra.mxu1 %v508_v7  ;;  %v294_v25 = vmul.f32 %v452_v23, %v285_v22  ;;  %v295_v26 = vmul.f32 %v452_v23, %v286_v24  ;;  %v440_v27 = vld [vmem:[%s686_s4] ss:$0 sm:$0xff] }
   0xb   :  { %493 = vmatprep.subr.mxu1 %v555_v2  ;;  %v446_v41 = vld [vmem:[%s688_s6] ss:$0 sm:$0xff]  ;;  %s559_s6 = smov [#allocation2]  }
   0xc   :  { %488 = vmatpush3.bf16.msra.mxu0 %v510_v21  ;;  %297 = vxpose.xlu0.b32.start [1/2] (short) (narrow) %v294_v25, 8  ;;  %s411_s13 = sshll.u32 %s559_s6, 4  ;;  %s412_s13 = int_to_ptr.vmem [resolvable:$true] %s411_s13 }
   0xd   :  { %s511_s14 = scalar_lea.vmem %s412_s13, 128  ;;  %p516_p1 = scmp.lt.s32.totalorder %s412_s13, %s412_s13 }
   0xe   :  { %p512_p0 = scmp.ne.s32.totalorder %s412_s13, %s511_s14  ;;  %p517_p2 = scmp.lt.s32.totalorder %s511_s14, %s511_s14 }
  0x10   :  { %298 = vxpose.xlu0.b32.end [2/2] (short) (narrow) %v295_v26, 8  ;;  %p518_p3 = por %p517_p2, %p516_p1 }
  0x12   :  { %p519_p4 = pnand %p518_p3, %p512_p0 }
  0x88   :  { %v313_v52 = vpop.trf.xlu0 }
  0xc6   :  { %v96_v9 = vpop.f32.mrf.mxu0 }
  0xc7   :  { %v97_v10 = vadd.f32 %v436_v8, %v96_v9 }
  0xc8   :  { %v475_v11 = vpop.f32.mrf.mxu0 }
  0xc9   :  { %v103_v12 = vmax.f32 %v97_v10, 0.0 }
  0xca   :  { %v99_v13 = vpop.f32.mrf.mxu0 }
  0xcb   :  { %v454_v14 = vpack.c.bf16 %v103_v12, %v103_v12  ;;  %v100_v15 = vadd.f32 %v436_v8, %v99_v13 }
  0xcc   :  { %v476_v16 = vpop.f32.mrf.mxu0 }
  0xcd   :  { %v104_v17 = vmax.f32 %v100_v15, 0.0  ;;  %114 = vst.msk [vmem:[#allocation2] sm:$0xf] %vm113_vm3, %v454_v14 }
  0xcf   :  { %v105_v18 = vpack.c.bf16 %v104_v17, %v103_v12  ;;  %v455_v19 = vpack.c.bf16 %v104_v17, %v104_v17 }
  0xd1   :  { %482 = vmatmul.mubr.msk.bf16.vlgmr.msra.gmra.mxu1 %vm139_vm4, %v105_v18  ;;  %115 = vst.msk [vmem:[#allocation2 + $0x4] sm:$0xf] %vm113_vm3, %v455_v19 }
  0xd2   :  { %497 = vmatprep.mubr.msk.f32.mxu1 %vm556_vm1, %v555_v2 }
 0x191   :  { %v177_v28 = vpop.f32.mrf.mxu1 }
 0x192   :  { %v178_v29 = vadd.f32 %v440_v27, %v177_v28 }
 0x193   :  { %v483_v30 = vpop.f32.mrf.mxu1 }
 0x194   :  { %v184_v31 = vmax.f32 %v178_v29, 0.0 }
 0x195   :  { %v180_v32 = vpop.f32.mrf.mxu1 }
 0x196   :  { %v181_v33 = vadd.f32 %v440_v27, %v180_v32  ;;  %v456_v34 = vpack.c.bf16 %v184_v31, %v184_v31 }
 0x197   :  { %v484_v35 = vpop.f32.mrf.mxu1 }
 0x198   :  { %v185_v36 = vmax.f32 %v181_v33, 0.0  ;;  %192 = vrot.lane.b32.xlu1 %v456_v34, %s557_s5 }
 0x19a   :  { %v186_v37 = vpack.c.bf16 %v185_v36, %v184_v31  ;;  %v457_v38 = vpack.c.bf16 %v185_v36, %v185_v36 }
 0x19c   :  { %194 = vrot.lane.b32.xlu1 %v457_v38, %s557_s5  ;;  %490 = vmatmul.mubr.msk.bf16.vlgmr.msra.gmra.mxu0 %vm139_vm4, %v186_v37 }
 0x20a   :  { %v193_v39 = vpop.permute.xlu1 %192 }
 0x20b   :  { %199 = vst.msk [vmem:[#allocation2] sm:$0xf] %vm198_vm5, %v193_v39 }
 0x20e   :  { %v195_v40 = vpop.permute.xlu1 %194 }
 0x20f   :  { %200 = vst.msk [vmem:[#allocation2 + $0x4] sm:$0xf] %vm198_vm5, %v195_v40 }
 0x25c   :  { %v261_v42 = vpop.f32.mrf.mxu0 }
 0x25d   :  { %v262_v43 = vadd.f32 %v446_v41, %v261_v42 }
 0x25e   :  { %v491_v44 = vpop.f32.mrf.mxu0 }
 0x25f   :  { %v268_v45 = vmax.f32 %v262_v43, 0.0 }
 0x260   :  { %v264_v46 = vpop.f32.mrf.mxu0 }
 0x261   :  { %v458_v47 = vpack.c.bf16 %v268_v45, %v268_v45  ;;  %v265_v48 = vadd.f32 %v446_v41, %v264_v46 }
 0x262   :  { %v492_v49 = vpop.f32.mrf.mxu0 }
 0x263   :  { %v269_v50 = vmax.f32 %v265_v48, 0.0  ;;  %276 = vrot.lane.b32.xlu0 %v458_v47, %s558_s8 }
 0x265   :  { %v459_v51 = vpack.c.bf16 %v269_v50, %v269_v50  ;;  %494 = vmatpush3.msra.mxu1 %v269_v50 }
 0x266   :  { %495 = vmatprep.subr.mxu1 %v555_v2 }
 0x267   :  { %496 = vmatpush3.msra.mxu1 %v268_v45  ;;  %278 = vrot.lane.b32.xlu1 %v459_v51, %s558_s8 }
 0x268   :  { %498 = vmatmul.mubr.msk.f32.vlgmr.msra.gmra.mxu1 %vm329_vm7, %v313_v52 }
 0x2d5   :  { %v277_v53 = vpop.permute.xlu0 %276 }
 0x2d6   :  { %283 = vst.msk [vmem:[#allocation2] sm:$0xf] %vm282_vm8, %v277_v53 }
 0x2d9   :  { %v279_v54 = vpop.permute.xlu1 %278 }
 0x2da   :  { %284 = vst.msk [vmem:[#allocation2 + $0x4] sm:$0xf] %vm282_vm8, %v279_v54 }
 0x2db   :  { %522 = shalt.err (!%p519_p4)
}
 0x2dc   :  { %s560_s15 = smov 4   ;;  %v296_v55 = vld [vmem:[#allocation4] sm:$0x3]  ;;  %s561_s18 = smov [#allocation4]  }
 0x2dd   :  { %417 = dma.vmem_to_hbm [thread:$0]  %s412_s13, 128, %s691_s9, [#allocation3], %s558_s8, %s558_s8, %s560_s15  }
 0x2de   :  { %s424_s1 = sshll.u32 %s561_s18, 4  ;;  %s425_s1 = int_to_ptr.vmem [resolvable:$true] %s424_s1 }
 0x2df   :  { %s531_s19 = scalar_lea.vmem %s425_s1, 32  ;;  %p536_p6 = scmp.lt.s32.totalorder %s425_s1, %s425_s1 }
 0x2e0   :  { %p532_p5 = scmp.ne.s32.totalorder %s425_s1, %s531_s19  ;;  %p537_p7 = scmp.lt.s32.totalorder %s531_s19, %s531_s19 }
 0x2e2   :  { %p538_p8 = por %p537_p7, %p536_p6 }
 0x2e4   :  { %p539_p9 = pnand %p538_p8, %p532_p5 }
 0x328   :  { %v399_v56 = vpop.f32.mrf.mxu1 }
 0x329   :  { %v403_v57 = vadd.f32 %v399_v56, %v296_v55 }
 0x32a   :  { %v499_v58 = vpop.f32.mrf.mxu1 }
 0x32b   :  { %405 = vst.msk [vmem:[#allocation4] sm:$0x3] %vm41_vm6, %v403_v57 }
 0x32c   :  { %542 = shalt.err (!%p539_p9)
}
 0x32d   :  { %427 = dma.vmem_to_hbm [thread:$0]  %s425_s1, 32, %s692_s10, [#allocation5]  }
 0x32e   :  { %551 = dma.done.wait [#allocation3], 128  }
 0x32f   :  { %552 = vsyncadd [#allocation3], 4294967168 }
 0x330   :  { %553 = dma.done.wait [#allocation5], 32  }
 0x331   :  { %554 = vsyncadd [#allocation5], 4294967264 }
 0x332   :  { %434 = vsyncpa [#allocation3], 1 }
 0x333   :  { %435 = vsyncpa [#allocation5], 1 }

</bundles_post_ra>
